<compile_context>
chip_gen: v7x
topology: tpu7x:2x2x1
jax: 0.10.0
libtpu: 0.0.40
codegen_flags: <defaults>
</compile_context>

<pallas_src>
import functools

import jax
import jax.numpy as jnp
from jax.experimental import pallas as pl
from jax.experimental.pallas import tpu as pltpu

EPS = 1e-6
LANE = 128
SUBLANES = 8
BASE_TILE_BYTES = 4 * 1024 * 1024      # native-dtype bytes per input pipeline buffer
VMEM_LIMIT_BYTES = 48 * 1024 * 1024    # <= ~48 MiB so it also fits v7x's 64 MiB/TC
NCORE_SHARDS = 2                       # leading "parallel" axis (v7x dual-TC / megacore)


def _round_down(v, m):
    return (v // m) * m


def _sublane_align(dtype):
    # f32 -> 8, bf16/f16 -> 16, int8/fp8 -> 32 rows per packed (8, 128) tile.
    itemsize = jnp.dtype(dtype).itemsize
    return SUBLANES * max(1, 4 // max(1, itemsize))


def _charbonnier_sum_kernel(x_ref, y_ref, o_ref, *, rows_valid, tile_rows,
                            steps_per_core):
    """Accumulates sum(sqrt((x-y)^2 + eps)) into a per-core (8, 128) partial-sum block."""
    c = pl.program_id(0)          # core shard ("parallel")
    i = pl.program_id(1)          # reduction step ("arbitrary")

    @pl.when(i == 0)
    def _init():
        o_ref[...] = jnp.zeros_like(o_ref)

    # Cast in-kernel: HBM traffic stays at native dtype width, math is f32.
    x = x_ref[...].astype(jnp.float32)
    y = y_ref[...].astype(jnp.float32)
    diff = x - y
    err = jnp.sqrt(diff * diff + jnp.float32(EPS))

    # Logical (unclamped) first global row of this block.
    row0 = (c * steps_per_core + i) * tile_rows
    needs_mask = row0 + tile_rows > rows_valid

    folded = (tile_rows // SUBLANES, SUBLANES, LANE)

    @pl.when(jnp.logical_not(needs_mask))
    def _hot():
        # Pure elementwise VPU/EUP work + cross-vreg adds into one (8, 128) vreg.
        o_ref[...] += err.reshape(folded).sum(axis=0)

    @pl.when(needs_mask)
    def _edge():
        # Only blocks touching the end of the valid row range pay for this.
        # Row-only compare (no int32 overflow) and a select (never err * mask).
        rid = jax.lax.broadcasted_iota(jnp.int32, err.shape, 0) + row0
        masked = jnp.where(rid < rows_valid, err, jnp.float32(0.0))
        o_ref[...] += masked.reshape(folded).sum(axis=0)


def _charbonnier_main_sum(x2, y2, rows_valid):
    """Kernel launch: sum of sqrt((x-y)^2 + eps) over a (rows, 128) lane-dense view."""
    rows = x2.shape[0]
    itemsize = max(jnp.dtype(x2.dtype).itemsize, jnp.dtype(y2.dtype).itemsize)
    align = max(_sublane_align(x2.dtype), _sublane_align(y2.dtype))
    # Constant bytes/step across dtypes (bf16 gets 2x the rows of f32).
    max_tile_rows = max(align, _round_down(BASE_TILE_BYTES // (LANE * itemsize), align))

    if rows < align:
        # Truly tiny input: pad up to one aligned block (a few KiB at most).
        pad = align - rows
        x2 = jnp.pad(x2, ((0, pad), (0, 0)))
        y2 = jnp.pad(y2, ((0, pad), (0, 0)))
        rows = align
        tile_rows = align
    else:
        # Tile never exceeds the array extent; the trailing partial block is
        # handled by the in-kernel row mask (no wrapper pad copy).
        tile_rows = min(max_tile_rows, _round_down(rows, align))

    total_steps = pl.cdiv(rows, tile_rows)
    ncores = NCORE_SHARDS if total_steps >= NCORE_SHARDS else 1
    steps_per_core = pl.cdiv(total_steps, ncores)
    last_block = total_steps - 1

    def in_idx(c, i):
        # Clamp so a core's trailing (fully out-of-range) steps re-read the last
        # valid block; their logical rows are >= rows_valid so they add zero.
        return (jnp.minimum(c * steps_per_core + i, last_block), 0)

    kernel = functools.partial(
        _charbonnier_sum_kernel,
        rows_valid=rows_valid,
        tile_rows=tile_rows,
        steps_per_core=steps_per_core,
    )

    partials = pl.pallas_call(
        kernel,
        out_shape=jax.ShapeDtypeStruct((ncores * SUBLANES, LANE), jnp.float32),
        grid_spec=pltpu.PrefetchScalarGridSpec(
            num_scalar_prefetch=0,
            grid=(ncores, steps_per_core),
            in_specs=[
                pl.BlockSpec((tile_rows, LANE), in_idx),
                pl.BlockSpec((tile_rows, LANE), in_idx),
            ],
            out_specs=pl.BlockSpec((SUBLANES, LANE), lambda c, i: (c, 0)),
        ),
        compiler_params=pltpu.CompilerParams(
            dimension_semantics=("parallel", "arbitrary"),
            vmem_limit_bytes=VMEM_LIMIT_BYTES,
        ),
    )(x2, y2)

    return jnp.sum(partials)


def l1_charbonnier_loss(x, y):
    """Pallas implementation of mean(sqrt((x - y)^2 + 1e-6))."""
    assert x.shape == y.shape, (x.shape, y.shape)
    n = int(x.size)
    assert n > 0

    rows = n // LANE
    n_main = rows * LANE
    x_flat = x.reshape(-1)
    y_flat = y.reshape(-1)

    # <128-element ragged tail: plain JAX in the wrapper (avoids a full-tensor
    # jnp.pad HBM copy for large inputs with n % 128 != 0).
    tail_sum = jnp.float32(0.0)
    if n_main < n:
        xt = x_flat[n_main:].astype(jnp.float32)
        yt = y_flat[n_main:].astype(jnp.float32)
        dt = xt - yt
        tail_sum = jnp.sum(jnp.sqrt(dt * dt + jnp.float32(EPS)))

    if rows == 0:
        return tail_sum / jnp.float32(n)

    if n_main == n:
        # Contiguous flatten/reshape: no data movement.
        x2 = x_flat.reshape(rows, LANE)
        y2 = y_flat.reshape(rows, LANE)
    else:
        # TODO(synk): the prefix slice below is one HBM copy; a flat 1-D BlockSpec
        # (128-divisible block length) would make the ragged case fully zero-copy.
        x2 = x_flat[:n_main].reshape(rows, LANE)
        y2 = y_flat[:n_main].reshape(rows, LANE)

    main_sum = _charbonnier_main_sum(x2, y2, rows)
    return (main_sum + tail_sum) / jnp.float32(n)


if __name__ == "__main__":
    key = jax.random.PRNGKey(0)
    kx, ky = jax.random.split(key)
    # Module takes two same-shaped tensors (e.g. NCHW images).
    X = jax.random.normal(kx, (2, 4, 16, 16), dtype=jnp.float32)
    Y = jax.random.normal(ky, (2, 4, 16, 16), dtype=jnp.float32)

    loss = jax.block_until_ready(l1_charbonnier_loss(X, Y))

    # Pure-JAX reference check of forward semantics.
    diff = X - Y
    ref = jnp.mean(jnp.sqrt(diff * diff + EPS))
    assert jnp.allclose(loss, ref, rtol=1e-5, atol=1e-6), (loss, ref)

    print("KERNEL_OK")
</pallas_src>

<mosaic_0001>
module attributes {stable_mosaic.version = 11 : i64} {
  func.func @_charbonnier_sum_kernel(%arg0: i32, %arg1: i32, %arg2: memref<16x128xf32, #tpu.memory_space<vmem>>, %arg3: memref<16x128xf32, #tpu.memory_space<vmem>>, %arg4: memref<8x128xf32, #tpu.memory_space<vmem>>) attributes {dimension_semantics = [#tpu.dimension_semantics<parallel>, #tpu.dimension_semantics<arbitrary>], iteration_bounds = array<i64: 1, 1>, scalar_prefetch = 0 : i64, scratch_operands = 0 : i64, tpu.core_type = #tpu.core_type<tc>, window_params = [{transform_indices = @transform_0, window_bounds = array<i64: 16, 128>}, {transform_indices = @transform_1, window_bounds = array<i64: 16, 128>}, {transform_indices = @transform_2, window_bounds = array<i64: 8, 128>}]} {
    %c0_i32 = arith.constant 0 : i32
    %0 = arith.cmpi eq, %arg1, %c0_i32 : i32
    %1 = arith.extui %0 : i1 to i32
    %c0_i32_0 = arith.constant 0 : i32
    %2 = arith.cmpi ne, %1, %c0_i32_0 : i32
    scf.if %2 {
      %cst_8 = arith.constant 0.000000e+00 : f32
      %20 = vector.broadcast %cst_8 : f32 to vector<8x128xf32>
      %c0_9 = arith.constant 0 : index
      %c0_10 = arith.constant 0 : index
      %21 = vector.load %arg4[%c0_9, %c0_10] : memref<8x128xf32, #tpu.memory_space<vmem>>, vector<8x128xf32>
      tpu.vector_store %arg4[%c0_9, %c0_10], %20 {strides = array<i32>} : memref<8x128xf32, #tpu.memory_space<vmem>>, vector<8x128xf32>,
    } else {
    }
    %c0 = arith.constant 0 : index
    %c0_1 = arith.constant 0 : index
    %3 = vector.load %arg2[%c0, %c0_1] : memref<16x128xf32, #tpu.memory_space<vmem>>, vector<16x128xf32>
    %c0_2 = arith.constant 0 : index
    %c0_3 = arith.constant 0 : index
    %4 = vector.load %arg3[%c0_2, %c0_3] : memref<16x128xf32, #tpu.memory_space<vmem>>, vector<16x128xf32>
    %5 = arith.subf %3, %4 : vector<16x128xf32>
    %6 = arith.mulf %5, %5 : vector<16x128xf32>
    %cst = arith.constant 9.99999997E-7 : f32
    %7 = vector.broadcast %cst : f32 to vector<16x128xf32>
    %8 = arith.addf %6, %7 : vector<16x128xf32>
    %9 = math.sqrt %8 : vector<16x128xf32>
    %c1_i32 = arith.constant 1 : i32
    %10 = arith.muli %arg0, %c1_i32 : i32
    %11 = arith.addi %10, %arg1 : i32
    %c16_i32 = arith.constant 16 : i32
    %12 = arith.muli %11, %c16_i32 : i32
    %c16_i32_4 = arith.constant 16 : i32
    %13 = arith.addi %12, %c16_i32_4 : i32
    %c16_i32_5 = arith.constant 16 : i32
    %14 = arith.cmpi sgt, %13, %c16_i32_5 : i32
    %true = arith.constant true
    %15 = arith.xori %14, %true : i1
    %16 = arith.extui %15 : i1 to i32
    %c0_i32_6 = arith.constant 0 : i32
    %17 = arith.cmpi ne, %16, %c0_i32_6 : i32
    scf.if %17 {
      %c0_8 = arith.constant 0 : index
      %c0_9 = arith.constant 0 : index
      %20 = vector.load %arg4[%c0_8, %c0_9] : memref<8x128xf32, #tpu.memory_space<vmem>>, vector<8x128xf32>
      %21 = vector.shape_cast %9 : vector<16x128xf32> to vector<2x8x128xf32>
      %cst_10 = arith.constant dense<0.000000e+00> : vector<8x128xf32>
      %22 = vector.multi_reduction <add>, %21, %cst_10 [0] : vector<2x8x128xf32> to vector<8x128xf32>
      %23 = arith.addf %20, %22 : vector<8x128xf32>
      %c0_11 = arith.constant 0 : index
      %c0_12 = arith.constant 0 : index
      %24 = vector.load %arg4[%c0_11, %c0_12] : memref<8x128xf32, #tpu.memory_space<vmem>>, vector<8x128xf32>
      tpu.vector_store %arg4[%c0_11, %c0_12], %23 {strides = array<i32>} : memref<8x128xf32, #tpu.memory_space<vmem>>, vector<8x128xf32>,
    } else {
    }
    %18 = arith.extui %14 : i1 to i32
    %c0_i32_7 = arith.constant 0 : i32
    %19 = arith.cmpi ne, %18, %c0_i32_7 : i32
    scf.if %19 {
      %20 = tpu.iota {dimensions = array<i32: 0>} : vector<16x128xi32>
      %21 = vector.broadcast %12 : i32 to vector<16x128xi32>
      %22 = arith.addi %20, %21 : vector<16x128xi32>
      %c16_i32_8 = arith.constant 16 : i32
      %23 = vector.broadcast %c16_i32_8 : i32 to vector<16x128xi32>
      %24 = arith.cmpi slt, %22, %23 : vector<16x128xi32>
      %cst_9 = arith.constant 0.000000e+00 : f32
      %25 = vector.broadcast %cst_9 : f32 to vector<16x128xf32>
      %26 = arith.select %24, %9, %25 : vector<16x128xi1>, vector<16x128xf32>
      %c0_10 = arith.constant 0 : index
      %c0_11 = arith.constant 0 : index
      %27 = vector.load %arg4[%c0_10, %c0_11] : memref<8x128xf32, #tpu.memory_space<vmem>>, vector<8x128xf32>
      %28 = vector.shape_cast %26 : vector<16x128xf32> to vector<2x8x128xf32>
      %cst_12 = arith.constant dense<0.000000e+00> : vector<8x128xf32>
      %29 = vector.multi_reduction <add>, %28, %cst_12 [0] : vector<2x8x128xf32> to vector<8x128xf32>
      %30 = arith.addf %27, %29 : vector<8x128xf32>
      %c0_13 = arith.constant 0 : index
      %c0_14 = arith.constant 0 : index
      %31 = vector.load %arg4[%c0_13, %c0_14] : memref<8x128xf32, #tpu.memory_space<vmem>>, vector<8x128xf32>
      tpu.vector_store %arg4[%c0_13, %c0_14], %30 {strides = array<i32>} : memref<8x128xf32, #tpu.memory_space<vmem>>, vector<8x128xf32>,
    } else {
    }
    return
  }
  func.func @transform_0(%arg0: i32, %arg1: i32) -> (i32, i32) {
    %c1_i32 = arith.constant 1 : i32
    %0 = arith.muli %arg0, %c1_i32 : i32
    %1 = arith.addi %0, %arg1 : i32
    %c0_i32 = arith.constant 0 : i32
    %2 = arith.minsi %1, %c0_i32 : i32
    %c0_i32_0 = arith.constant 0 : i32
    %c0_i32_1 = arith.constant 0 : i32
    return %2, %c0_i32_0 : i32, i32
  }
  func.func @transform_1(%arg0: i32, %arg1: i32) -> (i32, i32) {
    %c1_i32 = arith.constant 1 : i32
    %0 = arith.muli %arg0, %c1_i32 : i32
    %1 = arith.addi %0, %arg1 : i32
    %c0_i32 = arith.constant 0 : i32
    %2 = arith.minsi %1, %c0_i32 : i32
    %c0_i32_0 = arith.constant 0 : i32
    %c0_i32_1 = arith.constant 0 : i32
    return %2, %c0_i32_0 : i32, i32
  }
  func.func @transform_2(%arg0: i32, %arg1: i32) -> (i32, i32) {
    %c0_i32 = arith.constant 0 : i32
    %c0_i32_0 = arith.constant 0 : i32
    return %arg0, %c0_i32 : i32, i32
  }
}

</mosaic_0001>

<bundles_post_ra>
// kernel: tpu_custom_call.1
= control target key start
LH: loop header
LB: loop body
LE: loop exit
PB: predicated region body
PF: predicated region fallthrough
CT: control target
= control target key end

     0   :  { %7 = vsyncpa [#allocation3], 0  ;;  %s276_s0 = inlined_call_operand.hbm [shape: f32[16,128], index: 0, kind: input, shape index: {}]   ;;  %s277_s1 = inlined_call_operand.hbm [shape: f32[16,128], index: 1, kind: input, shape index: {}]   ;;  %s278_s2 = inlined_call_operand.hbm [shape: f32[8,128], index: 2, kind: output, shape index: {}]  }
   0x1   :  { %8 = vsyncpa [#allocation6], 0 }
   0x2   :  { %9 = vsyncpa [#allocation4], 0  ;;  %s220_s9 = smov [#allocation2]   ;;  %s148_s13 = scalar_lea.hbm %s276_s0, 256 }
   0x3   :  { %s21_s10 = sshll.u32 %s220_s9, 4  ;;  %p149_p0 = scmp.ne.s32.totalorder %s276_s0, %s148_s13  ;;  %s22_s10 = int_to_ptr.vmem [resolvable:$true] %s21_s10 }
   0x4   :  { %p152_p1 = scmp.lt.u32.totalorder %s148_s13, %s276_s0 }
   0x6   :  { %p154_p2 = pnand %p152_p1, %p149_p0 }
   0x8   :  { %157 = shalt.err (!%p154_p2)
}
   0x9   :  { %s158_s18 = scalar_lea.vmem %s22_s10, 256  ;;  %p163_p4 = scmp.lt.s32.totalorder %s22_s10, %s22_s10 }
   0xa   :  { %p159_p3 = scmp.ne.s32.totalorder %s22_s10, %s158_s18  ;;  %p164_p5 = scmp.lt.s32.totalorder %s158_s18, %s158_s18 }
   0xc   :  { %p165_p6 = por %p164_p5, %p163_p4 }
   0xe   :  { %p166_p7 = pnand %p165_p6, %p159_p3 }
  0x10   :  { %169 = shalt.err (!%p166_p7)
}
  0x11   :  { %s221_s19 = smov 128   ;;  %s222_s20 = smov 8  }
  0x12   :  { %27 = dma.hbm_to_vmem [thread:$0]  %s276_s0, 256, %s22_s10, [#allocation3], %s221_s19, %s221_s19, %s222_s20  }
  0x13   :  { %s223_s23 = smov [#allocation5]   ;;  %s170_s27 = scalar_lea.hbm %s277_s1, 256 }
  0x14   :  { %s39_s24 = sshll.u32 %s223_s23, 4  ;;  %p171_p8 = scmp.ne.s32.totalorder %s277_s1, %s170_s27  ;;  %s40_s24 = int_to_ptr.vmem [resolvable:$true] %s39_s24 }
  0x15   :  { %p174_p9 = scmp.lt.u32.totalorder %s170_s27, %s277_s1 }
  0x17   :  { %p176_p10 = pnand %p174_p9, %p171_p8 }
  0x19   :  { %179 = shalt.err (!%p176_p10)
}
  0x1a   :  { %s180_s4 = scalar_lea.vmem %s40_s24, 256  ;;  %p185_p12 = scmp.lt.s32.totalorder %s40_s24, %s40_s24 }
  0x1b   :  { %p181_p11 = scmp.ne.s32.totalorder %s40_s24, %s180_s4  ;;  %p186_p13 = scmp.lt.s32.totalorder %s180_s4, %s180_s4 }
  0x1d   :  { %p187_p0 = por %p186_p13, %p185_p12 }
  0x1f   :  { %p188_p1 = pnand %p187_p0, %p181_p11 }
  0x21   :  { %191 = shalt.err (!%p188_p1)
}
  0x22   :  { %45 = dma.hbm_to_vmem [thread:$0]  %s277_s1, 256, %s40_s24, [#allocation6], %s221_s19, %s221_s19, %s222_s20  }
  0x23   :  { %214 = dma.done.wait [#allocation3], 256  }
  0x24   :  { %215 = vsyncadd [#allocation3], 4294967040 }
  0x25   :  { %216 = dma.done.wait [#allocation6], 256  }
  0x26   :  { %217 = vsyncadd [#allocation6], 4294967040  ;;  %v65_v0 = vld [vmem:[#allocation2] sm:$0xff]  ;;  %v66_v1 = vld [vmem:[#allocation2 + $0x8] sm:$0xff]  ;;  %s224_s1 = smov [#allocation7]  }
  0x27   :  { %v67_v2 = vld [vmem:[#allocation5] sm:$0xff]  ;;  %v68_v3 = vld [vmem:[#allocation5 + $0x8] sm:$0xff]  ;;  %s124_s6 = sshll.u32 %s224_s1, 4  ;;  %s125_s6 = int_to_ptr.vmem [resolvable:$true] %s124_s6 }
  0x28   :  { %v69_v4 = vsub.f32 %v65_v0, %v67_v2  ;;  %v70_v5 = vsub.f32 %v66_v1, %v68_v3  ;;  %s192_s7 = scalar_lea.vmem %s125_s6, 128  ;;  %p197_p3 = scmp.lt.s32.totalorder %s125_s6, %s125_s6 }
  0x29   :  { %p193_p2 = scmp.ne.s32.totalorder %s125_s6, %s192_s7  ;;  %p198_p4 = scmp.lt.s32.totalorder %s192_s7, %s192_s7 }
  0x2a   :  { %v71_v6 = vmul.f32 %v69_v4, %v69_v4  ;;  %v72_v7 = vmul.f32 %v70_v5, %v70_v5 }
  0x2b   :  { %p199_p5 = por %p198_p4, %p197_p3 }
  0x2c   :  { %v73_v8 = vadd.f32 1e-06, %v71_v6  ;;  %v74_v9 = vadd.f32 1e-06, %v72_v7 }
  0x2d   :  { %p200_p6 = pnand %p199_p5, %p193_p2 }
  0x2e   :  { %144 = vrsqrt.f32 %v73_v8  ;;  %vm77_vm0 = vcmp.eq.f32.partialorder %v73_v8, inf  ;;  %v80_v11 = vand.u32 2147483648, %v73_v8  ;;  %vm79_vm1 = vcmp.eq.f32.partialorder %v73_v8, 0.0 }
  0x2f   :  { %146 = vrsqrt.f32 %v74_v9  ;;  %vm84_vm2 = vcmp.eq.f32.partialorder %v74_v9, inf  ;;  %v87_v14 = vand.u32 2147483648, %v74_v9  ;;  %vm86_vm3 = vcmp.eq.f32.partialorder %v74_v9, 0.0 }
  0x38   :  { %v145_v10 = vpop.eup %144 }
  0x39   :  { %v147_v12 = vpop.eup %146  ;;  %v76_v13 = vmul.f32 %v145_v10, %v73_v8 }
  0x3a   :  { %v83_v15 = vmul.f32 %v147_v12, %v74_v9 }
  0x3b   :  { %v78_v16 = vsel %vm77_vm0, %v73_v8, %v76_v13 }
  0x3c   :  { %v81_v17 = vsel %vm79_vm1, %v80_v11, %v78_v16  ;;  %v85_v18 = vsel %vm84_vm2, %v74_v9, %v83_v15 }
  0x3d   :  { %v88_v19 = vsel %vm86_vm3, %v87_v14, %v85_v18 }
  0x3e   :  { %v98_v20 = vadd.f32 %v88_v19, %v81_v17 }
  0x40   :  { %100 = vst [vmem:[#allocation7] sm:$0xff] %v98_v20 }
  0x41   :  { %203 = shalt.err (!%p200_p6)
}
  0x42   :  { %s204_s10 = scalar_lea.hbm %s278_s2, 128 }
  0x43   :  { %p205_p7 = scmp.ne.s32.totalorder %s278_s2, %s204_s10  ;;  %p208_p8 = scmp.lt.u32.totalorder %s204_s10, %s278_s2 }
  0x45   :  { %p210_p9 = pnand %p208_p8, %p205_p7 }
  0x47   :  { %213 = shalt.err (!%p210_p9)
}
  0x48   :  { %127 = dma.vmem_to_hbm [thread:$0]  %s125_s6, 128, %s278_s2, [#allocation4]  }
  0x49   :  { %218 = dma.done.wait [#allocation4], 128  }
  0x4a   :  { %219 = vsyncadd [#allocation4], 4294967168 }
  0x4b   :  { %131 = vsyncpa [#allocation3], 1 }
  0x4c   :  { %132 = vsyncpa [#allocation6], 1 }
  0x4d   :  { %133 = vsyncpa [#allocation4], 1 }

</bundles_post_ra>
